<compile_context>
chip_gen: v7x
topology: tpu7x:2x2x1
jax: 0.10.0
libtpu: 0.0.40
codegen_flags: <defaults>
</compile_context>

<pallas_src>
import jax
import jax.numpy as jnp
from jax import lax
from jax.experimental import pallas as pl
from jax.experimental.pallas import tpu as pltpu

NEG_SLOPE = 0.01   # nn.LeakyReLU() default negative_slope
CHUNK = 128        # batch rows per inner-loop step (one lane width)


def _leaky_relu(x):
    # negative_slope < 1  =>  leaky_relu(x) == max(x, slope * x): 2 VPU ops.
    return jnp.maximum(x, NEG_SLOPE * x)


def ffn_kernel(x_ref, w1_ref, b1_ref, w2_ref, b2_ref, w3_ref, b3_ref, o_ref):
    # Weights / biases are tiny and resident; read once per grid step.
    w1 = w1_ref[...]          # (32, 8)  PyTorch [out, in] layout, used as-is
    b1 = b1_ref[...]          # (32, 1)
    w2 = w2_ref[...]          # (16, 32)
    b2 = b2_ref[...]          # (16, 1)
    w3 = w3_ref[...]          # (16, 1)
    b3 = b3_ref[0]            # scalar, from SMEM

    n_chunks = x_ref.shape[0] // CHUNK   # static: tile_b is a multiple of CHUNK

    def body(c, carry):
        start = pl.multiple_of(c * CHUNK, CHUNK)
        x_c = x_ref[pl.ds(start, CHUNK), :]                    # (CHUNK, 8)

        # Layer 1: contract x's 8-feature dim against W1 -> h1 (32, CHUNK).
        # Batch lands in the 128-wide lane dim and stays there (lane-dense).
        h1 = lax.dot_general(
            w1, x_c, dimension_numbers=(((1,), (1,)), ((), ())),
            preferred_element_type=jnp.float32)
        h1 = _leaky_relu(h1 + b1)                              # b1 lane-broadcast

        # Layer 2: (16, 32) @ (32, CHUNK) -> (16, CHUNK) on the MXU.
        h2 = jnp.dot(w2, h1, preferred_element_type=jnp.float32)
        h2 = _leaky_relu(h2 + b2)

        # Layer 3 (16 -> 1) on VPU + XLU: broadcast-mul with the (16, 1) weight
        # column, sublane-reduce -> lane-dense (1, CHUNK) output row.
        out = jnp.sum(h2 * w3, axis=0, keepdims=True) + b3
        o_ref[:, pl.ds(start, CHUNK)] = out.astype(o_ref.dtype)  # aligned vst
        return carry

    lax.fori_loop(0, n_chunks, body, None)


def feedforward_ref(x, p):
    """Pure-JAX reference (also used as the small-batch fast path)."""
    h1 = _leaky_relu(x @ p["w1"].T + p["b1"])
    h2 = _leaky_relu(h1 @ p["w2"].T + p["b2"])
    return h2 @ p["w3"].T + p["b3"]


def feedforward(x, params, *, tile_b=4096, min_pallas_batch=1024):
    """x: [B, 8]. params: PyTorch-layout weights ([out, in]) and biases ([out])."""
    B, F = x.shape
    assert F == 8

    # Small-batch fast path: one grid step would be pure fixed cost; XLA fuses
    # this 3-layer MLP into a couple of ops and wins at small B.
    if B < max(CHUNK, int(min_pallas_batch)):
        return feedforward_ref(x, params)

    # Batch tile: respect the caller's request, rounded to a multiple of 128
    # (lane-dense I/O, whole inner chunks), capped at 8192 for v5e's 16 MiB
    # scoped-VMEM default.
    tile_b = (max(CHUNK, min(int(tile_b), 8192)) // CHUNK) * CHUNK
    # Keep >= 2 grid steps whenever possible so dimension_semantics=("parallel",)
    # can shard the grid across both TensorCores on v7x.
    half_b = (((B + 1) // 2 + CHUNK - 1) // CHUNK) * CHUNK
    tile_b = min(tile_b, max(CHUNK, half_b))
    num_tiles = pl.cdiv(B, tile_b)   # ragged last tile handled by Pallas masking

    w1 = params["w1"]                   # (32, 8)
    b1 = params["b1"].reshape(-1, 1)    # (32, 1)
    w2 = params["w2"]                   # (16, 32)
    b2 = params["b2"].reshape(-1, 1)    # (16, 1)
    w3 = params["w3"].reshape(-1, 1)    # (1, 16) -> (16, 1) column
    b3 = params["b3"].reshape(1)        # (1,) scalar -> SMEM

    rep = lambda i: (0, 0)              # weights/biases resident across all steps

    flops = 2 * B * (8 * 32 + 32 * 16 + 16)
    bytes_accessed = (x.size + B) * x.dtype.itemsize + 4 * sum(
        a.size for a in (w1, b1, w2, b2, w3, b3))

    out = pl.pallas_call(
        ffn_kernel,
        out_shape=jax.ShapeDtypeStruct((1, B), x.dtype),
        grid_spec=pltpu.PrefetchScalarGridSpec(
            num_scalar_prefetch=0,
            grid=(num_tiles,),
            in_specs=[
                pl.BlockSpec((tile_b, 8), lambda i: (i, 0)),        # x tile
                pl.BlockSpec((32, 8), rep),                         # W1
                pl.BlockSpec((32, 1), rep),                         # b1
                pl.BlockSpec((16, 32), rep),                        # W2
                pl.BlockSpec((16, 1), rep),                         # b2
                pl.BlockSpec((16, 1), rep),                         # W3 column
                pl.BlockSpec(memory_space=pltpu.MemorySpace.SMEM),  # b3 scalar
            ],
            # Lane-dense (1, tile_b) output row; the ragged final block
            # (B % tile_b != 0) relies on Pallas's masked boundary writes --
            # no host-side pad, no padded out_shape.
            out_specs=pl.BlockSpec((1, tile_b), lambda i: (0, i)),
        ),
        compiler_params=pltpu.CompilerParams(
            dimension_semantics=("parallel",),
        ),
        cost_estimate=pl.CostEstimate(
            flops=flops, transcendentals=0, bytes_accessed=bytes_accessed),
    )(x, w1, b1, w2, b2, w3, b3)

    # (1, B) row-major == flat batch order; restore [B, 1].
    return out.reshape(B, 1)


def init_params(key):
    """Deterministic init mirroring nn.Linear: U(-1/sqrt(fan_in), 1/sqrt(fan_in)),
    weights stored PyTorch-style as [out_features, in_features]."""
    def linear(key, fan_in, fan_out):
        kw, kb = jax.random.split(key)
        bound = fan_in ** -0.5
        w = jax.random.uniform(kw, (fan_out, fan_in), jnp.float32, -bound, bound)
        b = jax.random.uniform(kb, (fan_out,), jnp.float32, -bound, bound)
        return w, b

    k1, k2, k3 = jax.random.split(key, 3)
    w1, b1 = linear(k1, 8, 32)
    w2, b2 = linear(k2, 32, 16)
    w3, b3 = linear(k3, 16, 1)
    return {"w1": w1, "b1": b1, "w2": w2, "b2": b2, "w3": w3, "b3": b3}


if __name__ == "__main__":
    key = jax.random.PRNGKey(0)
    kx, kp = jax.random.split(key)
    params = init_params(kp)

    # Small batch (matches the toy module usage) -> XLA fast path.
    x_small = jax.random.normal(kx, (8, 8), jnp.float32)
    out_small = jax.block_until_ready(feedforward(x_small, params))
    assert out_small.shape == (8, 1), out_small.shape
    assert jnp.allclose(out_small, feedforward_ref(x_small, params),
                        atol=1e-5, rtol=1e-5)

    # Pallas path: 2 full tiles (multi-step "parallel" grid, inner chunk loop).
    B = 2816
    x = jax.random.normal(kx, (B, 8), jnp.float32)
    out = jax.block_until_ready(feedforward(x, params))
    assert out.shape == (B, 1), out.shape
    assert jnp.allclose(out, feedforward_ref(x, params), atol=1e-5, rtol=1e-5)

    # Pallas path with a ragged final tile: masked boundary writes, no host pad.
    B2 = 2600
    x2 = jax.random.normal(kx, (B2, 8), jnp.float32)
    out2 = jax.block_until_ready(feedforward(x2, params))
    assert out2.shape == (B2, 1), out2.shape
    assert jnp.allclose(out2, feedforward_ref(x2, params), atol=1e-5, rtol=1e-5)

    print("KERNEL_OK")
</pallas_src>

<mosaic_0001>
module attributes {stable_mosaic.version = 11 : i64} {
  func.func @ffn_kernel(%arg0: i32, %arg1: memref<1408x8xf32, #tpu.memory_space<vmem>>, %arg2: memref<32x8xf32, #tpu.memory_space<vmem>>, %arg3: memref<32x1xf32, #tpu.memory_space<vmem>>, %arg4: memref<16x32xf32, #tpu.memory_space<vmem>>, %arg5: memref<16x1xf32, #tpu.memory_space<vmem>>, %arg6: memref<16x1xf32, #tpu.memory_space<vmem>>, %arg7: memref<1xf32, #tpu.memory_space<smem>>, %arg8: memref<1x1408xf32, #tpu.memory_space<vmem>>) attributes {dimension_semantics = [#tpu.dimension_semantics<parallel>], iteration_bounds = array<i64: 2>, scalar_prefetch = 0 : i64, scratch_operands = 0 : i64, tpu.core_type = #tpu.core_type<tc>, window_params = [{transform_indices = @transform_0, window_bounds = array<i64: 1408, 8>}, {pipeline_mode = #tpu.pipeline_mode<synchronous>, transform_indices = @transform_1, window_bounds = array<i64: 32, 8>}, {pipeline_mode = #tpu.pipeline_mode<synchronous>, transform_indices = @transform_2, window_bounds = array<i64: 32, 1>}, {pipeline_mode = #tpu.pipeline_mode<synchronous>, transform_indices = @transform_3, window_bounds = array<i64: 16, 32>}, {pipeline_mode = #tpu.pipeline_mode<synchronous>, transform_indices = @transform_4, window_bounds = array<i64: 16, 1>}, {pipeline_mode = #tpu.pipeline_mode<synchronous>, transform_indices = @transform_5, window_bounds = array<i64: 16, 1>}, {transform_indices = @transform_6, window_bounds = array<i64: 1>}, {transform_indices = @transform_7, window_bounds = array<i64: 1, 1408>}]} {
    %c0 = arith.constant 0 : index
    %c0_0 = arith.constant 0 : index
    %0 = vector.load %arg2[%c0, %c0_0] : memref<32x8xf32, #tpu.memory_space<vmem>>, vector<32x8xf32>
    %c0_1 = arith.constant 0 : index
    %c0_2 = arith.constant 0 : index
    %1 = vector.load %arg3[%c0_1, %c0_2] : memref<32x1xf32, #tpu.memory_space<vmem>>, vector<32x1xf32>
    %c0_3 = arith.constant 0 : index
    %c0_4 = arith.constant 0 : index
    %2 = vector.load %arg4[%c0_3, %c0_4] : memref<16x32xf32, #tpu.memory_space<vmem>>, vector<16x32xf32>
    %c0_5 = arith.constant 0 : index
    %c0_6 = arith.constant 0 : index
    %3 = vector.load %arg5[%c0_5, %c0_6] : memref<16x1xf32, #tpu.memory_space<vmem>>, vector<16x1xf32>
    %c0_7 = arith.constant 0 : index
    %c0_8 = arith.constant 0 : index
    %4 = vector.load %arg6[%c0_7, %c0_8] : memref<16x1xf32, #tpu.memory_space<vmem>>, vector<16x1xf32>
    %c0_9 = arith.constant 0 : index
    %5 = memref.load %arg7[%c0_9] : memref<1xf32, #tpu.memory_space<smem>>
    %c0_i32 = arith.constant 0 : i32
    %c11_i32 = arith.constant 11 : i32
    %6 = arith.addi %c0_i32, %c11_i32 : i32
    %c1_i32 = arith.constant 1 : i32
    scf.for %arg9 = %c0_i32 to %6 step %c1_i32  : i32 {
      %c128_i32 = arith.constant 128 : i32
      %7 = arith.muli %arg9, %c128_i32 : i32
      %8 = tpu.assume_multiple %7, 128 : i32
      %9 = arith.index_cast %8 : i32 to index
      %c0_11 = arith.constant 0 : index
      %10 = vector.load %arg1[%9, %c0_11] : memref<1408x8xf32, #tpu.memory_space<vmem>>, vector<128x8xf32>
      %cst = arith.constant dense<0.000000e+00> : vector<32x128xf32>
      %11 = tpu.matmul %0, %10, %cst {dimension_numbers = #tpu.dot_dimension_numbers<[1], [1], [0], [0], [0, 0, 1, 0], [], []>} : vector<32x8xf32>, vector<128x8xf32>, vector<32x128xf32> -> vector<32x128xf32>
      %12 = vector.broadcast %1 : vector<32x1xf32> to vector<32x128xf32>
      %13 = arith.addf %11, %12 : vector<32x128xf32>
      %cst_12 = arith.constant 0.00999999977 : f32
      %14 = vector.broadcast %cst_12 : f32 to vector<32x128xf32>
      %15 = arith.mulf %14, %13 : vector<32x128xf32>
      %16 = arith.maximumf %13, %15 : vector<32x128xf32>
      %cst_13 = arith.constant dense<0.000000e+00> : vector<16x128xf32>
      %17 = tpu.matmul %2, %16, %cst_13 {dimension_numbers = #tpu.dot_dimension_numbers<[1], [0], [0], [1], [0, 0, 1, 1], [], []>} : vector<16x32xf32>, vector<32x128xf32>, vector<16x128xf32> -> vector<16x128xf32>
      %18 = vector.broadcast %3 : vector<16x1xf32> to vector<16x128xf32>
      %19 = arith.addf %17, %18 : vector<16x128xf32>
      %cst_14 = arith.constant 0.00999999977 : f32
      %20 = vector.broadcast %cst_14 : f32 to vector<16x128xf32>
      %21 = arith.mulf %20, %19 : vector<16x128xf32>
      %22 = arith.maximumf %19, %21 : vector<16x128xf32>
      %23 = vector.broadcast %4 : vector<16x1xf32> to vector<16x128xf32>
      %24 = arith.mulf %22, %23 : vector<16x128xf32>
      %cst_15 = arith.constant dense<0.000000e+00> : vector<128xf32>
      %25 = vector.multi_reduction <add>, %24, %cst_15 [0] : vector<16x128xf32> to vector<128xf32>
      %26 = vector.shape_cast %25 : vector<128xf32> to vector<1x128xf32>
      %27 = vector.broadcast %5 : f32 to vector<1x128xf32>
      %28 = arith.addf %26, %27 : vector<1x128xf32>
      %c0_16 = arith.constant 0 : index
      %29 = arith.index_cast %8 : i32 to index
      %30 = vector.load %arg8[%c0_16, %29] : memref<1x1408xf32, #tpu.memory_space<vmem>>, vector<1x128xf32>
      tpu.vector_store %arg8[%c0_16, %29], %28 {strides = array<i32>} : memref<1x1408xf32, #tpu.memory_space<vmem>>, vector<1x128xf32>,
    }
    %c11_i32_10 = arith.constant 11 : i32
    return
  }
  func.func @transform_0(%arg0: i32) -> (i32, i32) {
    %c0_i32 = arith.constant 0 : i32
    %c0_i32_0 = arith.constant 0 : i32
    return %arg0, %c0_i32 : i32, i32
  }
  func.func @transform_1(%arg0: i32) -> (i32, i32) {
    %c0_i32 = arith.constant 0 : i32
    %c0_i32_0 = arith.constant 0 : i32
    %c0_i32_1 = arith.constant 0 : i32
    return %c0_i32, %c0_i32_0 : i32, i32
  }
  func.func @transform_2(%arg0: i32) -> (i32, i32) {
    %c0_i32 = arith.constant 0 : i32
    %c0_i32_0 = arith.constant 0 : i32
    %c0_i32_1 = arith.constant 0 : i32
    return %c0_i32, %c0_i32_0 : i32, i32
  }
  func.func @transform_3(%arg0: i32) -> (i32, i32) {
    %c0_i32 = arith.constant 0 : i32
    %c0_i32_0 = arith.constant 0 : i32
    %c0_i32_1 = arith.constant 0 : i32
    return %c0_i32, %c0_i32_0 : i32, i32
  }
  func.func @transform_4(%arg0: i32) -> (i32, i32) {
    %c0_i32 = arith.constant 0 : i32
    %c0_i32_0 = arith.constant 0 : i32
    %c0_i32_1 = arith.constant 0 : i32
    return %c0_i32, %c0_i32_0 : i32, i32
  }
  func.func @transform_5(%arg0: i32) -> (i32, i32) {
    %c0_i32 = arith.constant 0 : i32
    %c0_i32_0 = arith.constant 0 : i32
    %c0_i32_1 = arith.constant 0 : i32
    return %c0_i32, %c0_i32_0 : i32, i32
  }
  func.func @transform_6(%arg0: i32) -> i32 {
    %c0_i32 = arith.constant 0 : i32
    %c0_i32_0 = arith.constant 0 : i32
    return %c0_i32 : i32
  }
  func.func @transform_7(%arg0: i32) -> (i32, i32) {
    %c0_i32 = arith.constant 0 : i32
    %c0_i32_0 = arith.constant 0 : i32
    return %c0_i32, %arg0 : i32, i32
  }
}

</mosaic_0001>

<bundles_post_ra>
// kernel: tpu_custom_call.1
= control target key start
LH: loop header
LB: loop body
LE: loop exit
PB: predicated region body
PF: predicated region fallthrough
CT: control target
= control target key end

     0   :  { %s1301_s0 = inlined_call_operand.vmem [shape: f32[2816,8], index: 0, kind: input, shape index: {}]   ;;  %s1302_s1 = inlined_call_operand.vmem [shape: f32[32,8], index: 1, kind: input, shape index: {}]   ;;  %s1303_s2 = inlined_call_operand.vmem [shape: f32[32,1], index: 2, kind: input, shape index: {}]   ;;  %s1304_s3 = inlined_call_operand.vmem [shape: f32[16,32], index: 3, kind: input, shape index: {}]   ;;  %s1305_s4 = inlined_call_operand.vmem [shape: f32[16,1], index: 4, kind: input, shape index: {}]   ;;  %s1306_s5 = inlined_call_operand.vmem [shape: f32[16,1], index: 5, kind: input, shape index: {}]   ;;  %s1307_s6 = inlined_call_operand.<no memory space> [shape: f32[1], index: 6, kind: input, shape index: {}]   ;;  %s1308_s7 = inlined_call_operand.hbm [shape: f32[1,2816], index: 7, kind: output, shape index: {}]  }
   0x1   :  { %12 = sst [smem:[#allocation2]] %s1307_s6 }
   0x2   :  { %13 = vsyncpa [#allocation4], 0 }
   0x3   :  { %15 = vsyncpa [#allocation4 + $0x1], 0  ;;  %s1032_s26 = smov 0   ;;  %s1034_s27 = smov 0  }
   0x4   :  { %s1036_s28 = smov 0   ;;  %s1038_s29 = smov 0  }
   0x5 LB: > { %s700_s6 = sadd.s32 4294967295, %s981_s29   ;;  %s701_s30 = sadd.s32 4294967294, %s981_s29   ;;  %s981_s29 = sphi %s1038_s29, %s1316_s29   ;;  %s977_s28 = sphi %s1036_s28, %s1315_s28   ;;  %s973_s27 = sphi %s1034_s27, %s1314_s27   ;;  %s969_s26 = sphi %s1032_s26, %s1313_s26  }
   0x6   : > { %s1055_s8 = sadd.s32 1, %s981_s29   ;;  %s180_s9 = sadd.s32 1, %s977_s28 }
   0x7   : > { %s177_s10 = ssub.s32 %s981_s29, %s1055_s8  ;;  %p190_p0 = scmp.ne.s32.totalorder %s977_s28, %s973_s27 }
   0x8   : > { %p178_p1 = scmp.eq.s32.totalorder %s177_s10, 0  ;;  %p191_p2 = scmp.eq.s32.totalorder %s700_s6, 1 }
   0x9   : > { %p196_p3 = scmp.ne.s32.totalorder %s973_s27, %s969_s26  ;;  %p197_p4 = scmp.eq.s32.totalorder %s701_s30, 1 }
   0xa   : > { %s1065_s11 = scalar_select %p178_p1, %s977_s28, %s180_s9  }
   0xb   : > { %p1067_p5 = por %p191_p2, %p190_p0  ;;  %p1071_p6 = por %p197_p4, %p196_p3 }
   0xc   : > { %p704_p7 = scmp.ge.s32.totalorder %s981_s29, 1  ;;  %p242_p8 = scmp.lt.s32.totalorder %s981_s29, 3 }
   0xe   : > { %p243_p9 = pnand %p704_p7, %p242_p8 }
   0xf   : > { %s271_s14 = sand.u32 (!%p243_p9), 1, %s973_s27   ;;  %s1078_s15 = smul.u32 (!%p243_p9), 176, %s700_s6  ;;  %v1083_v0 = vld [vmem:[%s1302_s1] sm:$0xff] (!%p243_p9)  ;;  %v1088_v1 = vld [vmem:[%s1302_s1 + $0x8] sm:$0xff] (!%p243_p9)  ;;  %v1093_v2 = vld [vmem:[%s1302_s1 + $0x10] sm:$0xff] (!%p243_p9) }
  0x10   : > { %246 = sbr.rel (%p243_p9) target bundleno = 576 (0x240), region = 48  ;;  %v1102_v3 = vld [vmem:[%s1302_s1 + $0x18] sm:$0xff] (!%p243_p9)  ;;  %v1107_v4 = vld [vmem:[%s1303_s2] sm:$0xff] (!%p243_p9)  ;;  %v1112_v5 = vld [vmem:[%s1303_s2 + $0x8] sm:$0xff] (!%p243_p9)  ;;  %s1114_s10 = sld [smem:[#allocation2]] (!%p243_p9) }
  0x11   : > { %s1097_s22 = smul.u32 (!%p243_p9), 11, %s271_s14  ;;  %p275_p10 = scmp.lt.s32.totalorder (!%p243_p9), %s1078_s15, 351  ;;  %v1120_v6 = vld [vmem:[%s1303_s2 + $0x10] sm:$0xff] (!%p243_p9)  ;;  %v1125_v7 = vld [vmem:[%s1303_s2 + $0x18] sm:$0xff] (!%p243_p9)  ;;  %v1130_v8 = vld [vmem:[%s1304_s3] sm:$0xff] (!%p243_p9) }
  0x12   : > { %v1135_v9 = vld [vmem:[%s1304_s3 + $0x8] sm:$0xff] (!%p243_p9)  ;;  %v1140_v10 = vld [vmem:[%s1305_s4] sm:$0xff] (!%p243_p9)  ;;  %s1164_s30 = smov (!%p243_p9), 0  }
  0x13   : > { %v1145_v11 = vld [vmem:[%s1305_s4 + $0x8] sm:$0xff] (!%p243_p9)  ;;  %v1151_v12 = vld [vmem:[%s1306_s5] sm:$0xff] (!%p243_p9)  ;;  %s273_s6 = scalar_lea.vmem (!%p243_p9), [#allocation3], %s1097_s22 }
  0x14   : > { %v1156_v13 = vld [vmem:[%s1306_s5 + $0x8] sm:$0xff] (!%p243_p9) }
  0x17   : > { %s276_s16 = scalar_select %p275_p10, %s1078_s15, 351 }
  0x19   : > { %s705_s21 = sshll.u32 %s276_s16, 3 }
  0x1a   : > { %s1161_s25 = scalar_lea.vmem %s1301_s0, %s705_s21 }
  0x1b LB: >> { %vm340_vm0 = vcmask 64512   ;;  %v987_v14 = vmov 0   ;;  %s706_s9 = sshll.u32 %s985_s30, 7  ;;  %vm504_vm2 = vcmask 261120   ;;  %s301_s30 = sadd.s32 1, %s985_s30   ;;  %s985_s30 = sphi %s1164_s30, %s301_s30  }
  0x1c   : >> { %791 = vmatprep.mubr.msk.f32.mxu0 %vm340_vm0, %v1083_v0  ;;  %913 = vset.pattern.permute.xlu0 %v987_v14  ;;  %s1176_s16 = scalar_lea.vmem %s1161_s25, %s706_s9  ;;  %vm1180_vm1 = vmpackc.low %vm340_vm0, %vm340_vm0  ;;  %s611_s17 = sshra.s32 %s706_s9, 7 }
  0x1d   : >> { %322 = vperm.xlu0 %913, %v1107_v4   ;;  %914 = vset.pattern.permute.xlu1 %v987_v14  ;;  %v304_v16 = vld [vmem:[%s1176_s16] sm:$0xff]  ;;  %v305_v17 = vld [vmem:[%s1176_s16 + $0x8] sm:$0xff]  ;;  %v306_v18 = vld [vmem:[%s1176_s16 + $0x10] sm:$0xff]  ;;  %s613_s18 = scalar_lea.vmem %s273_s6, %s611_s17 [#allocation3]  ;;  %p298_p11 = scmp.ge.s32.totalorder %s301_s30, 11  }
  0x1e   : >> { %332 = vperm.xlu1 %914, %v1120_v6   ;;  %v808_v19 = vpack.c.bf16 %v305_v17, %v304_v16  ;;  %v307_v20 = vld [vmem:[%s1176_s16 + $0x18] sm:$0xff]  ;;  %v308_v22 = vld [vmem:[%s1176_s16 + $0x20] sm:$0xff]  ;;  %v309_v23 = vld [vmem:[%s1176_s16 + $0x28] sm:$0xff]  ;;  %805 = vmatprep.mubr.msk.f32.mxu1 %vm504_vm2, %v1130_v8  ;;  %s1261_s21 = scalar_lea.hbm (%p298_p11), %s1308_s7, %s1078_s15  ;;  %s634_s23 = sshll.u32 (%p298_p11), %s273_s6, 4  ;;  %s635_s23 = int_to_ptr.vmem [resolvable:$true] %s634_s23 }
  0x1f   : >> { %v814_v21 = vpack.c.bf16 %v307_v20, %v306_v18  ;;  %v820_v24 = vpack.c.bf16 %v309_v23, %v308_v22  ;;  %v310_v25 = vld [vmem:[%s1176_s16 + $0x30] sm:$0xff]  ;;  %v311_v26 = vld [vmem:[%s1176_s16 + $0x38] sm:$0xff]  ;;  %v312_v28 = vld [vmem:[%s1176_s16 + $0x40] sm:$0xff]  ;;  %s620_s24 = scalar_lea.sflag (%p298_p11), [#allocation4], %s271_s14  ;;  %s915_s9 = scalar_lea.vmem (%p298_p11), %s635_s23, 176 }
  0x20   : >> { %810 = vmatprep.subr.msk.bf16.mxu0 %vm1180_vm1, %v808_v19  ;;  %v826_v27 = vpack.c.bf16 %v311_v26, %v310_v25  ;;  %v313_v29 = vld [vmem:[%s1176_s16 + $0x48] sm:$0xff]  ;;  %v314_v31 = vld [vmem:[%s1176_s16 + $0x50] sm:$0xff]  ;;  %v315_v32 = vld [vmem:[%s1176_s16 + $0x58] sm:$0xff]  ;;  %p916_p12 = scmp.ne.s32.totalorder (%p298_p11), %s635_s23, %s915_s9  ;;  %s988_s30 = smov (%p298_p11), [#allocation3]  }
  0x21   : >> { %327 = vperm.xlu0 %913, %v1112_v5   ;;  %813 = vmatpush3.bf16.xpose.msk.msra.mxu0 %vm1180_vm1, %v808_v19  ;;  %v832_v30 = vpack.c.bf16 %v313_v29, %v312_v28  ;;  %v838_v33 = vpack.c.bf16 %v315_v32, %v314_v31  ;;  %v316_v34 = vld [vmem:[%s1176_s16 + $0x60] sm:$0xff]  ;;  %v317_v35 = vld [vmem:[%s1176_s16 + $0x68] sm:$0xff]  ;;  %v318_v37 = vld [vmem:[%s1176_s16 + $0x70] sm:$0xff]  ;;  %v614_v31 = vlaneseq }
  0x22   : >> { %337 = vperm.xlu1 %914, %v1125_v7   ;;  %816 = vmatprep.subr.msk.bf16.mxu0 %vm1180_vm1, %v814_v21  ;;  %v844_v36 = vpack.c.bf16 %v317_v35, %v316_v34  ;;  %v319_v38 = vld [vmem:[%s1176_s16 + $0x78] sm:$0xff]  ;;  %p917_p13 = pnand (%p298_p11), %p916_p12, %p1067_p5 }
  0x23   : >> { %v850_v39 = vpack.c.bf16 %v319_v38, %v318_v37  ;;  %vm616_vm3 = vcmp.lt.s32.totalorder %v614_v31, 128 }
  0x24   : > { %p918_p0 = pneg (%p298_p11), %p917_p13 }
  0x25   : >> { %496 = vperm.xlu0 %913, %v1140_v10  }
  0x26   : >> { %501 = vperm.xlu1 %914, %v1145_v11  }
  0x29   : >> { %592 = vperm.xlu0 %913, %v1151_v12   ;;  %819 = vmatpush3.bf16.xpose.msk.msra.mxu0 %vm1180_vm1, %v814_v21 }
  0x2a   : >> { %597 = vperm.xlu1 %914, %v1156_v13   ;;  %822 = vmatprep.subr.msk.bf16.mxu0 %vm1180_vm1, %v820_v24 }
  0x31   : >> { %825 = vmatpush3.bf16.xpose.msk.msra.mxu0 %vm1180_vm1, %v820_v24 }
  0x32   : >> { %828 = vmatprep.subr.msk.bf16.mxu0 %vm1180_vm1, %v826_v27 }
  0x39   : >> { %831 = vmatpush3.bf16.xpose.msk.msra.mxu0 %vm1180_vm1, %v826_v27 }
  0x3a   : >> { %834 = vmatprep.subr.msk.bf16.mxu0 %vm1180_vm1, %v832_v30 }
  0x41   : >> { %837 = vmatpush3.bf16.xpose.msk.msra.mxu0 %vm1180_vm1, %v832_v30 }
  0x42   : >> { %840 = vmatprep.subr.msk.bf16.mxu0 %vm1180_vm1, %v838_v33 }
  0x49   : >> { %843 = vmatpush3.bf16.xpose.msk.msra.mxu0 %vm1180_vm1, %v838_v33  ;;  %v609_v33 = vstv %s1114_s10  ;;  %s919_s10 = sshll.u32 (%p298_p11), %s988_s30, 4  ;;  %s920_s10 = int_to_ptr.vmem [resolvable:$false] %s919_s10 }
  0x4a   : >> { %846 = vmatprep.subr.msk.bf16.mxu0 %vm1180_vm1, %v844_v36  ;;  %s921_s25 = scalar_lea.vmem (%p298_p11), %s920_s10, 352  ;;  %p922_p1 = scmp.lt.s32.totalorder (%p298_p11), %s635_s23, %s920_s10 }
  0x4b   : > { %p923_p2 = scmp.lt.s32.totalorder (%p298_p11), %s921_s25, %s915_s9 }
  0x4d   : > { %p924_p3 = por (%p298_p11), %p923_p2, %p922_p1 }
  0x4f   : > { %p925_p4 = pnand (%p298_p11), %p924_p3, %p918_p0 }
  0x51   : >> { %849 = vmatpush3.bf16.xpose.msk.msra.mxu0 %vm1180_vm1, %v844_v36 }
  0x52   : >> { %852 = vmatprep.subr.msk.bf16.mxu0 %vm1180_vm1, %v850_v39 }
  0x59   : >> { %855 = vmatpush3.bf16.xpose.msk.msra.mxu0 %vm1180_vm1, %v850_v39 }
  0x60   : >> { %792 = vmatmul.mubr.msk.f32.vlgmr.msra.gmra.mrb[0].mxu0 %vm340_vm0, %v1088_v1 }
  0x61   : >> { %794 = vmatprep.mubr.msk.f32.mxu0 %vm340_vm0, %v1093_v2 }
  0x64   : >> { %795 = vmatmul.mubr.msk.f32.gmra.mrb[2].mxu0 %vm340_vm0, %v1102_v3 }
  0x9c   : >> { %v323_v40 = vpop.permute.xlu0 %322 }
  0x9d   : >> { %v333_v41 = vpop.permute.xlu1 %332 }
  0xa0   : >> { %v328_v42 = vpop.permute.xlu0 %327 }
  0xa1   : >> { %v338_v48 = vpop.permute.xlu1 %337 }
  0xa4   : >> { %v497_v14 = vpop.permute.xlu0 %496 }
  0xa5   : >> { %v502_v62 = vpop.permute.xlu1 %501 }
  0xa8   : >> { %v593_v23 = vpop.permute.xlu0 %592 }
  0xa9   : >> { %v598_v21 = vpop.permute.xlu1 %597 }
 0x133   : >> { %v793_v43 = vpop.f32.mrb[0].mxu0 }
 0x134   : >> { %v473_v44 = vadd.f32 %v793_v43, %v328_v42  ;;  %v467_v45 = vpop.f32.mrb[1].mxu0 }
 0x135   : >> { %v468_v46 = vadd.f32 %v467_v45, %v323_v40 }
 0x136   : >> { %v487_v47 = vmul.f32 0.01, %v473_v44 }
 0x137   : >> { %v486_v49 = vmul.f32 0.01, %v468_v46  ;;  %v796_v50 = vpop.f32.mrb[2].mxu0 }
 0x138   : >> { %v491_v51 = vmax.f32 %v473_v44, %v487_v47  ;;  %v483_v52 = vadd.f32 %v796_v50, %v338_v48  ;;  %v477_v53 = vpop.f32.mrb[3].mxu0 }
 0x139   : >> { %v490_v54 = vmax.f32 %v468_v46, %v486_v49  ;;  %v478_v55 = vadd.f32 %v477_v53, %v333_v41 }
 0x13a   : >> { %v489_v56 = vmul.f32 0.01, %v483_v52 }
 0x13b   : >> { %v488_v57 = vmul.f32 0.01, %v478_v55  ;;  %v856_v58 = vpack.c.bf16 %v491_v51, %v490_v54 }
 0x13c   : >> { %v493_v59 = vmax.f32 %v483_v52, %v489_v56 }
 0x13d   : >> { %v492_v60 = vmax.f32 %v478_v55, %v488_v57  ;;  %857 = vmatprep.subr.bf16.mxu1 %v856_v58 }
 0x13e   : >> { %859 = vmatpush3.bf16.msra.mxu1 %v856_v58 }
 0x13f   : >> { %v860_v61 = vpack.c.bf16 %v493_v59, %v492_v60 }
 0x141   : >> { %861 = vmatprep.subr.bf16.mxu1 %v860_v61 }
 0x142   : >> { %863 = vmatpush3.bf16.msra.mxu1 %v860_v61 }
 0x145   : >> { %806 = vmatmul.mubr.msk.f32.vlgmr.msra.gmra.mrb[0].mxu1 %vm504_vm2, %v1135_v9 }
 0x218   : >> { %v807_v63 = vpop.f32.mrb[0].mxu1 }
 0x219   : >> { %v583_v15 = vadd.f32 %v807_v63, %v502_v62  ;;  %v577_v16 = vpop.f32.mrb[1].mxu1 }
 0x21a   : >> { %v578_v17 = vadd.f32 %v577_v16, %v497_v14 }
 0x21b   : >> { %v587_v18 = vmul.f32 0.01, %v583_v15 }
 0x21c   : >> { %v586_v19 = vmul.f32 0.01, %v578_v17 }
 0x21d   : >> { %v589_v20 = vmax.f32 %v583_v15, %v587_v18 }
 0x21e   : >> { %v588_v22 = vmax.f32 %v578_v17, %v586_v19 }
 0x21f   : >> { %v601_v24 = vmul.f32 %v598_v21, %v589_v20 }
 0x220   : >> { %v600_v25 = vmul.f32 %v593_v23, %v588_v22 }
 0x222   : >> { %v602_v26 = vadd.f32 %v601_v24, %v600_v25 }
 0x224   : >> { %v603_v27 = vrot.slane %v602_v26, 4 }
 0x226   : >> { %v604_v28 = vadd.f32 %v603_v27, %v602_v26 }
 0x228   : >> { %v605_v29 = vrot.slane %v604_v28, 2 }
 0x22a   : >> { %v606_v30 = vadd.f32 %v605_v29, %v604_v28 }
 0x22c   : >> { %v607_v32 = vrot.slane %v606_v30, 1  ;;  %300 = sbr.rel (!%p298_p11) target bundleno = 27 (0x1b), region = 92 }
 0x22e   : >> { %v608_v34 = vadd.f32 %v607_v32, %v606_v30 }
 0x230   : >> { %v610_v35 = vadd.f32 %v609_v33, %v608_v34 }
 0x232   : >> { %618 = vst.msk [vmem:[%s613_s18] sm:$0x1] %vm616_vm3, %v610_v35 }
 0x233   : > { %928 = shalt.err (!%p925_p4)
}
 0x234   : > { %s929_s14 = scalar_lea.hbm %s1261_s21, 176  ;;  %s933_s6 = scalar_lea.hbm %s1308_s7, 352 }
 0x235   : > { %p930_p7 = scmp.ne.s32.totalorder %s1261_s21, %s929_s14  ;;  %p934_p10 = scmp.lt.u32.totalorder %s1261_s21, %s1308_s7 }
 0x236   : > { %p935_p11 = scmp.lt.u32.totalorder %s933_s6, %s929_s14  ;;  %p937_p13 = scmp.lt.u32.totalorder %s929_s14, %s1261_s21 }
 0x237   : > { %p931_p8 = pnand %p930_p7, %p1067_p5 }
 0x238   : > { %p936_p12 = por %p935_p11, %p934_p10 }
 0x239   : > { %p932_p9 = pneg %p931_p8 }
 0x23a   : > { %p938_p0 = por %p937_p13, %p936_p12 }
 0x23c   : > { %p939_p1 = pnand %p938_p0, %p932_p9 }
 0x23e   : > { %942 = shalt.err (!%p939_p1)
}
 0x23f   : > { %865 = dma.vmem_to_hbm [thread:$0]  (%p1067_p5), %s635_s23, 176, %s1261_s21, %s620_s24  }
 0x240 PF: > { %p871_p2 = scmp.ge.s32.totalorder %s981_s29, 2  ;;  %s646_s18 = sand.u32 1, %s969_s26  }
 0x241   : > { %s647_s19 = scalar_lea.sflag [#allocation4], %s646_s18 }
 0x242   : > { %p868_p3 = pnand %p871_p2, %p1071_p6 }
 0x244   : > { %964 = dma.done.wait (!%p868_p3), %s647_s19, 176  }
 0x245   : > { %966 = vsyncadd (!%p868_p3), %s647_s19, 4294967120  ;;  %p18_p4 = scmp.ge.s32.totalorder %s1055_s8, 4   ;;  %s1313_s26 = smov %s973_s27 }
 0x246   : > { %s1314_s27 = smov %s977_s28  ;;  %s1315_s28 = smov %s1065_s11 }
 0x247   : > { %s1316_s29 = smov %s1055_s8  ;;  %20 = sbr.rel (!%p18_p4) target bundleno = 5 (0x5), region = 103 }
 0x24e   :  { %652 = vsyncpa [#allocation4], 1 }
 0x24f   :  { %654 = vsyncpa [#allocation4 + $0x1], 1 }

</bundles_post_ra>
